<compile_context>
chip_gen: v7x
topology: tpu7x:2x2x1
jax: 0.10.0
libtpu: 0.0.40
codegen_flags: <defaults>
</compile_context>

<pallas_src>
import functools

import jax
import jax.numpy as jnp
from jax import lax
from jax.experimental import pallas as pl
from jax.experimental.pallas import tpu as pltpu

LANE = 128
TARGET_BLOCK_BYTES = 2 << 20  # ~2 MiB per block; in+out double-buffered = 8 MiB,
                              # under v5e's 16 MiB scoped-VMEM default.


def _dropout_kernel(seed_ref, x_ref, o_ref, *, threshold, inv_keep, block_elems, width):
    pid = pl.program_id(0)
    base = pid.astype(jnp.uint32) * jnp.uint32(block_elems)

    shape = x_ref.shape
    row = lax.broadcasted_iota(jnp.int32, shape, 0)
    col = lax.broadcasted_iota(jnp.int32, shape, 1)
    idx = base + (row * jnp.int32(width) + col).astype(jnp.uint32)

    # Mix the seed in with a Weyl constant, then lowbias32-style finalizer.
    h = idx + seed_ref[0].astype(jnp.uint32) * jnp.uint32(0x9E3779B9)
    h = h ^ (h >> 16)
    h = h * jnp.uint32(0x7FEB352D)
    h = h ^ (h >> 15)
    h = h * jnp.uint32(0x846CA68B)
    h = h ^ (h >> 16)

    # drop iff h < threshold, where threshold = round(p * 2**32)
    keep = h >= jnp.uint32(threshold)

    x = x_ref[...]
    scaled = x * jnp.asarray(inv_keep, dtype=x.dtype)
    o_ref[...] = jnp.where(keep, scaled, jnp.zeros_like(scaled)).astype(o_ref.dtype)


def fairseq_dropout(x, p, seed, *, training=True, apply_during_inference=False):
    """Pallas implementation of FairseqDropout.forward."""
    if not (training or apply_during_inference) or p <= 0.0:
        return x  # identity path (eval mode / p == 0)
    if p >= 1.0:
        return jnp.zeros_like(x)  # F.dropout(p=1) drops everything

    orig_shape = x.shape
    orig_dtype = x.dtype
    total = x.size

    # ---- lane-dense slab layout --------------------------------------------
    width = 1024 if total >= 1024 else LANE
    dtype_bytes = jnp.dtype(orig_dtype).itemsize
    # target ~TARGET_BLOCK_BYTES per block, rows a multiple of 8
    target_rows = max(8, (TARGET_BLOCK_BYTES // (width * dtype_bytes)) // 8 * 8)
    rows = pl.cdiv(total, width)
    block_rows = min(target_rows, pl.cdiv(rows, 8) * 8)
    rows_padded = pl.cdiv(rows, block_rows) * block_rows
    padded_total = rows_padded * width

    xf = jnp.ravel(x)
    needs_pad = padded_total != total
    if needs_pad:
        xf = jnp.pad(xf, (0, padded_total - total))
    x2 = xf.reshape(rows_padded, width)

    # ---- kernel launch ------------------------------------------------------
    threshold = min(int(round(float(p) * (1 << 32))), (1 << 32) - 1)
    inv_keep = 1.0 / (1.0 - float(p))
    seed_arr = jnp.asarray([seed], dtype=jnp.int32)
    grid = (rows_padded // block_rows,)

    kernel = functools.partial(
        _dropout_kernel,
        threshold=threshold,
        inv_keep=inv_keep,
        block_elems=block_rows * width,
        width=width,
    )

    out2 = pl.pallas_call(
        kernel,
        out_shape=jax.ShapeDtypeStruct((rows_padded, width), orig_dtype),
        grid_spec=pltpu.PrefetchScalarGridSpec(
            num_scalar_prefetch=1,
            grid=grid,
            in_specs=[
                pl.BlockSpec((block_rows, width), lambda i, seed: (i, 0)),
            ],
            out_specs=pl.BlockSpec((block_rows, width), lambda i, seed: (i, 0)),
        ),
        compiler_params=pltpu.CompilerParams(
            # Randomness is a pure function of (seed, global index), so blocks
            # are order-independent -> safe to shard across TCs (v7x megacore).
            dimension_semantics=("parallel",),
        ),
    )(seed_arr, x2)

    if needs_pad:
        return out2.reshape(-1)[:total].reshape(orig_shape)
    return out2.reshape(orig_shape)


if __name__ == "__main__":
    key = jax.random.PRNGKey(0)
    # Small NCHW-like input consistent with typical usage of this module.
    x = jax.random.normal(key, (2, 4, 16, 16), dtype=jnp.float32)
    p = 0.25

    # Training mode: dropout kernel is exercised.
    y_train = fairseq_dropout(x, p, seed=1234, training=True)
    y_train = jax.block_until_ready(y_train)

    # Eval mode: identity (module semantics).
    y_eval = fairseq_dropout(x, p, seed=1234, training=False)
    y_eval = jax.block_until_ready(y_eval)

    # p == 1 edge case: all zeros.
    y_all_drop = jax.block_until_ready(fairseq_dropout(x, 1.0, seed=7, training=True))

    # Basic sanity checks on dropout semantics.
    assert y_train.shape == x.shape and y_train.dtype == x.dtype
    assert bool(jnp.all(y_eval == x))
    assert bool(jnp.all(y_all_drop == 0.0))
    zero_frac = float(jnp.mean(y_train == 0.0))
    kept = y_train != 0.0
    # kept elements must equal x / (1 - p)
    assert bool(
        jnp.allclose(
            jnp.where(kept, y_train, 0.0),
            jnp.where(kept, x / (1.0 - p), 0.0),
            rtol=1e-5,
            atol=1e-5,
        )
    )
    # drop fraction roughly p
    assert abs(zero_frac - p) < 0.1, zero_frac

    print("KERNEL_OK")
</pallas_src>

<mosaic_0001>
module attributes {stable_mosaic.version = 11 : i64} {
  func.func @_dropout_kernel(%arg0: i32, %arg1: memref<1xi32, #tpu.memory_space<smem>>, %arg2: memref<8x1024xf32, #tpu.memory_space<vmem>>, %arg3: memref<8x1024xf32, #tpu.memory_space<vmem>>) attributes {dimension_semantics = [#tpu.dimension_semantics<parallel>], iteration_bounds = array<i64: 1>, scalar_prefetch = 1 : i64, scratch_operands = 0 : i64, tpu.core_type = #tpu.core_type<tc>, window_params = [{transform_indices = @transform_0, window_bounds = array<i64: 8, 1024>}, {transform_indices = @transform_1, window_bounds = array<i64: 8, 1024>}]} {
    %c8192_i32 = arith.constant 8192 : i32
    %0 = arith.muli %arg0, %c8192_i32 : i32
    %1 = tpu.iota {dimensions = array<i32: 0>} : vector<8x1024xi32>
    %2 = tpu.iota {dimensions = array<i32: 1>} : vector<8x1024xi32>
    %c1024_i32 = arith.constant 1024 : i32
    %3 = vector.broadcast %c1024_i32 : i32 to vector<8x1024xi32>
    %4 = arith.muli %1, %3 : vector<8x1024xi32>
    %5 = arith.addi %4, %2 : vector<8x1024xi32>
    %6 = vector.broadcast %0 : i32 to vector<8x1024xi32>
    %7 = arith.addi %6, %5 : vector<8x1024xi32>
    %c0 = arith.constant 0 : index
    %8 = memref.load %arg1[%c0] : memref<1xi32, #tpu.memory_space<smem>>
    %c-1640531527_i32 = arith.constant -1640531527 : i32
    %9 = arith.muli %8, %c-1640531527_i32 : i32
    %10 = vector.broadcast %9 : i32 to vector<8x1024xi32>
    %11 = arith.addi %7, %10 : vector<8x1024xi32>
    %c16_i32 = arith.constant 16 : i32
    %12 = vector.broadcast %c16_i32 : i32 to vector<8x1024xi32>
    %13 = arith.shrui %11, %12 : vector<8x1024xi32>
    %14 = arith.xori %11, %13 : vector<8x1024xi32>
    %c2146121005_i32 = arith.constant 2146121005 : i32
    %15 = vector.broadcast %c2146121005_i32 : i32 to vector<8x1024xi32>
    %16 = arith.muli %14, %15 : vector<8x1024xi32>
    %c15_i32 = arith.constant 15 : i32
    %17 = vector.broadcast %c15_i32 : i32 to vector<8x1024xi32>
    %18 = arith.shrui %16, %17 : vector<8x1024xi32>
    %19 = arith.xori %16, %18 : vector<8x1024xi32>
    %c-2073254261_i32 = arith.constant -2073254261 : i32
    %20 = vector.broadcast %c-2073254261_i32 : i32 to vector<8x1024xi32>
    %21 = arith.muli %19, %20 : vector<8x1024xi32>
    %c16_i32_0 = arith.constant 16 : i32
    %22 = vector.broadcast %c16_i32_0 : i32 to vector<8x1024xi32>
    %23 = arith.shrui %21, %22 : vector<8x1024xi32>
    %24 = arith.xori %21, %23 : vector<8x1024xi32>
    %c1073741824_i32 = arith.constant 1073741824 : i32
    %25 = vector.broadcast %c1073741824_i32 : i32 to vector<8x1024xi32>
    %26 = arith.cmpi uge, %24, %25 : vector<8x1024xi32>
    %c0_1 = arith.constant 0 : index
    %c0_2 = arith.constant 0 : index
    %27 = vector.load %arg2[%c0_1, %c0_2] : memref<8x1024xf32, #tpu.memory_space<vmem>>, vector<8x1024xf32>
    %cst = arith.constant 1.33333337 : f32
    %28 = vector.broadcast %cst : f32 to vector<8x1024xf32>
    %29 = arith.mulf %27, %28 : vector<8x1024xf32>
    %cst_3 = arith.constant 0.000000e+00 : f32
    %30 = vector.broadcast %cst_3 : f32 to vector<8x1024xf32>
    %31 = arith.select %26, %29, %30 : vector<8x1024xi1>, vector<8x1024xf32>
    %c0_4 = arith.constant 0 : index
    %c0_5 = arith.constant 0 : index
    %32 = vector.load %arg3[%c0_4, %c0_5] : memref<8x1024xf32, #tpu.memory_space<vmem>>, vector<8x1024xf32>
    tpu.vector_store %arg3[%c0_4, %c0_5], %31 {strides = array<i32>} : memref<8x1024xf32, #tpu.memory_space<vmem>>, vector<8x1024xf32>,
    return
  }
  func.func @transform_0(%arg0: i32, %arg1: memref<1xi32, #tpu.memory_space<smem>>) -> (i32, i32) {
    %c0_i32 = arith.constant 0 : i32
    %c0_i32_0 = arith.constant 0 : i32
    return %arg0, %c0_i32 : i32, i32
  }
  func.func @transform_1(%arg0: i32, %arg1: memref<1xi32, #tpu.memory_space<smem>>) -> (i32, i32) {
    %c0_i32 = arith.constant 0 : i32
    %c0_i32_0 = arith.constant 0 : i32
    return %arg0, %c0_i32 : i32, i32
  }
}

</mosaic_0001>

<bundles_post_ra>
// kernel: tpu_custom_call.1
= control target key start
LH: loop header
LB: loop body
LE: loop exit
PB: predicated region body
PF: predicated region fallthrough
CT: control target
= control target key end

     0   :  { %8 = vsyncpa [#allocation5], 0  ;;  %s295_s0 = inlined_call_operand.<no memory space> [shape: s32[1], index: 0, kind: input, shape index: {}]   ;;  %s296_s1 = inlined_call_operand.hbm [shape: f32[8,1024], index: 1, kind: input, shape index: {}]   ;;  %s297_s2 = inlined_call_operand.hbm [shape: f32[8,1024], index: 2, kind: output, shape index: {}]  }
   0x1   :  { %9 = vsyncpa [#allocation6], 0  ;;  %s233_s9 = smov [#allocation4]   ;;  %s185_s13 = scalar_lea.hbm %s296_s1, 1024 }
   0x2   :  { %s16_s10 = sshll.u32 %s233_s9, 4  ;;  %p186_p0 = scmp.ne.s32.totalorder %s296_s1, %s185_s13  ;;  %s17_s10 = int_to_ptr.vmem [resolvable:$true] %s16_s10 }
   0x3   :  { %p189_p1 = scmp.lt.u32.totalorder %s185_s13, %s296_s1 }
   0x5   :  { %p191_p2 = pnand %p189_p1, %p186_p0 }
   0x7   :  { %194 = shalt.err (!%p191_p2)
}
   0x8   :  { %s195_s18 = scalar_lea.vmem %s17_s10, 1024  ;;  %p200_p4 = scmp.lt.s32.totalorder %s17_s10, %s17_s10 }
   0x9   :  { %p196_p3 = scmp.ne.s32.totalorder %s17_s10, %s195_s18  ;;  %p201_p5 = scmp.lt.s32.totalorder %s195_s18, %s195_s18 }
   0xb   :  { %p202_p6 = por %p201_p5, %p200_p4 }
   0xd   :  { %p203_p7 = pnand %p202_p6, %p196_p3 }
   0xf   :  { %206 = shalt.err (!%p203_p7)
}
  0x10   :  { %19 = dma.hbm_to_vmem [thread:$0]  %s296_s1, 1024, %s17_s10, [#allocation5]  }
  0x11   :  { %229 = dma.done.wait [#allocation5], 1024  }
  0x12   :  { %230 = vsyncadd [#allocation5], 4294966272  ;;  %v24_v0 = vlaneseq  ;;  %s54_s23 = smul.u32 2654435769, %s295_s0  ;;  %v136_v16 = vld [vmem:[#allocation4] sm:$0xff]  ;;  %v137_v17 = vld [vmem:[#allocation4 + $0x8] sm:$0xff] }
  0x13   :  { %v138_v18 = vld [vmem:[#allocation4 + $0x10] sm:$0xff]  ;;  %v265_v23 = vmul.f32 1.3333334, %v136_v16  ;;  %v139_v25 = vld [vmem:[#allocation4 + $0x18] sm:$0xff]  ;;  %v140_v26 = vld [vmem:[#allocation4 + $0x20] sm:$0xff]  ;;  %s234_s0 = smov [#allocation7]  }
  0x14   :  { %v25_v1 = vshrl.u32 %v24_v0, 7  ;;  %v27_v2 = vand.u32 127, %v24_v0  ;;  %v55_v3 = vstv %s54_s23  ;;  %v267_v28 = vmul.f32 1.3333334, %v137_v17  ;;  %v141_v36 = vld [vmem:[#allocation4 + $0x28] sm:$0xff]  ;;  %s174_s1 = sshll.u32 %s234_s0, 4  ;;  %s175_s1 = int_to_ptr.vmem [resolvable:$true] %s174_s1 }
  0x15   :  { %v269_v30 = vmul.f32 1.3333334, %v138_v18  ;;  %v271_v34 = vmul.f32 1.3333334, %v139_v25  ;;  %v273_v39 = vmul.f32 1.3333334, %v140_v26  ;;  %p212_p9 = scmp.lt.s32.totalorder %s175_s1, %s175_s1 }
  0x16   :  { %v35_v4 = vmul.u32 1024, %v25_v1  ;;  %v28_v5 = vadd.s32 128, %v27_v2  ;;  %v29_v6 = vadd.s32 256, %v27_v2  ;;  %v30_v7 = vadd.s32 384, %v27_v2  ;;  %s207_s24 = scalar_lea.vmem %s175_s1, 1024 }
  0x17   :  { %v31_v8 = vadd.s32 512, %v27_v2  ;;  %v32_v9 = vadd.s32 640, %v27_v2  ;;  %v33_v10 = vadd.s32 768, %v27_v2  ;;  %v34_v11 = vadd.s32 896, %v27_v2  ;;  %p208_p8 = scmp.ne.s32.totalorder %s175_s1, %s207_s24  ;;  %p213_p10 = scmp.lt.s32.totalorder %s207_s24, %s207_s24 }
  0x18   :  { %v36_v12 = vadd.s32 %v35_v4, %v27_v2  ;;  %v37_v13 = vadd.s32 %v35_v4, %v28_v5  ;;  %v38_v14 = vadd.s32 %v35_v4, %v29_v6  ;;  %v39_v15 = vadd.s32 %v35_v4, %v30_v7  ;;  %v142_v6 = vld [vmem:[#allocation4 + $0x30] sm:$0xff] }
  0x19   :  { %v40_v19 = vadd.s32 %v35_v4, %v31_v8  ;;  %v41_v20 = vadd.s32 %v35_v4, %v32_v9  ;;  %v42_v21 = vadd.s32 %v35_v4, %v33_v10  ;;  %v43_v27 = vadd.s32 %v35_v4, %v34_v11  ;;  %p214_p11 = por %p213_p10, %p212_p9 }
  0x1a   :  { %v56_v22 = vadd.s32 %v55_v3, %v36_v12  ;;  %v57_v24 = vadd.s32 %v55_v3, %v37_v13  ;;  %v58_v29 = vadd.s32 %v55_v3, %v38_v14  ;;  %v59_v31 = vadd.s32 %v55_v3, %v39_v15 }
  0x1b   :  { %v60_v35 = vadd.s32 %v55_v3, %v40_v19  ;;  %v61_v40 = vadd.s32 %v55_v3, %v41_v20  ;;  %v62_v44 = vadd.s32 %v55_v3, %v42_v21  ;;  %v275_v48 = vmul.f32 1.3333334, %v141_v36  ;;  %p215_p12 = pnand %p214_p11, %p208_p8 }
  0x1c   :  { %v64_v32 = vshrl.u32 %v56_v22, 16  ;;  %v65_v33 = vshrl.u32 %v57_v24, 16  ;;  %v66_v37 = vshrl.u32 %v58_v29, 16  ;;  %v67_v38 = vshrl.u32 %v59_v31, 16 }
  0x1d   :  { %v68_v43 = vshrl.u32 %v60_v35, 16  ;;  %v69_v47 = vshrl.u32 %v61_v40, 16  ;;  %v70_v52 = vshrl.u32 %v62_v44, 16  ;;  %v63_v56 = vadd.s32 %v55_v3, %v43_v27 }
  0x1e   :  { %v72_v41 = vxor.u32 %v64_v32, %v56_v22  ;;  %v73_v42 = vxor.u32 %v65_v33, %v57_v24  ;;  %v74_v45 = vxor.u32 %v66_v37, %v58_v29  ;;  %v75_v46 = vxor.u32 %v67_v38, %v59_v31 }
  0x1f   :  { %v76_v51 = vxor.u32 %v68_v43, %v60_v35  ;;  %v77_v55 = vxor.u32 %v69_v47, %v61_v40  ;;  %v78_v60 = vxor.u32 %v70_v52, %v62_v44  ;;  %v71_v0 = vshrl.u32 %v63_v56, 16 }
  0x20   :  { %v80_v49 = vmul.u32 2146121005, %v72_v41  ;;  %v81_v50 = vmul.u32 2146121005, %v73_v42  ;;  %v150_v17 = vmul.f32 1.3333334, %v142_v6 }
  0x21   :  { %v82_v53 = vmul.u32 2146121005, %v74_v45  ;;  %v83_v54 = vmul.u32 2146121005, %v75_v46  ;;  %v79_v10 = vxor.u32 %v71_v0, %v63_v56 }
  0x22   :  { %v88_v57 = vshrl.u32 %v80_v49, 15  ;;  %v89_v58 = vshrl.u32 %v81_v50, 15  ;;  %v84_v59 = vmul.u32 2146121005, %v76_v51  ;;  %v85_v63 = vmul.u32 2146121005, %v77_v55 }
  0x23   :  { %v90_v61 = vshrl.u32 %v82_v53, 15  ;;  %v91_v62 = vshrl.u32 %v83_v54, 15  ;;  %v86_v5 = vmul.u32 2146121005, %v78_v60  ;;  %v87_v26 = vmul.u32 2146121005, %v79_v10 }
  0x24   :  { %v96_v1 = vxor.u32 %v88_v57, %v80_v49  ;;  %v97_v2 = vxor.u32 %v89_v58, %v81_v50  ;;  %v92_v4 = vshrl.u32 %v84_v59, 15  ;;  %v93_v9 = vshrl.u32 %v85_v63, 15  ;;  %v143_v50 = vld [vmem:[#allocation4 + $0x38] sm:$0xff] }
  0x25   :  { %v98_v7 = vxor.u32 %v90_v61, %v82_v53  ;;  %v99_v8 = vxor.u32 %v91_v62, %v83_v54  ;;  %v94_v13 = vshrl.u32 %v86_v5, 15  ;;  %v95_v37 = vshrl.u32 %v87_v26, 15 }
  0x26   :  { %v104_v11 = vmul.u32 2221713035, %v96_v1  ;;  %v105_v12 = vmul.u32 2221713035, %v97_v2  ;;  %v100_v3 = vxor.u32 %v92_v4, %v84_v59  ;;  %v101_v16 = vxor.u32 %v93_v9, %v85_v63 }
  0x27   :  { %v106_v14 = vmul.u32 2221713035, %v98_v7  ;;  %v107_v15 = vmul.u32 2221713035, %v99_v8  ;;  %v102_v21 = vxor.u32 %v94_v13, %v86_v5  ;;  %v103_v49 = vxor.u32 %v95_v37, %v87_v26 }
  0x28   :  { %v112_v18 = vshrl.u32 %v104_v11, 16  ;;  %v113_v19 = vshrl.u32 %v105_v12, 16  ;;  %v108_v20 = vmul.u32 2221713035, %v100_v3  ;;  %v109_v25 = vmul.u32 2221713035, %v101_v16 }
  0x29   :  { %v114_v22 = vshrl.u32 %v106_v14, 16  ;;  %v115_v24 = vshrl.u32 %v107_v15, 16  ;;  %v110_v32 = vmul.u32 2221713035, %v102_v21 }
  0x2a   :  { %v120_v27 = vxor.u32 %v112_v18, %v104_v11  ;;  %v121_v29 = vxor.u32 %v113_v19, %v105_v12  ;;  %v116_v31 = vshrl.u32 %v108_v20, 16  ;;  %v117_v36 = vshrl.u32 %v109_v25, 16 }
  0x2b   :  { %v122_v33 = vxor.u32 %v114_v22, %v106_v14  ;;  %v123_v35 = vxor.u32 %v115_v24, %v107_v15  ;;  %v118_v40 = vshrl.u32 %v110_v32, 16 }
  0x2c   :  { %vm128_vm0 = vcmp.ge.u32.totalorder %v120_v27, 1073741824  ;;  %vm129_vm1 = vcmp.ge.u32.totalorder %v121_v29, 1073741824  ;;  %v124_v38 = vxor.u32 %v116_v31, %v108_v20  ;;  %v125_v45 = vxor.u32 %v117_v36, %v109_v25 }
  0x2d   :  { %v152_v41 = vsel %vm128_vm0, %v265_v23, 0.0  ;;  %v153_v42 = vsel %vm129_vm1, %v267_v28, 0.0  ;;  %vm130_vm2 = vcmp.ge.u32.totalorder %v122_v33, 1073741824  ;;  %vm131_vm3 = vcmp.ge.u32.totalorder %v123_v35, 1073741824 }
  0x2e   :  { %160 = vst [vmem:[#allocation7] sm:$0xff] %v152_v41  ;;  %161 = vst [vmem:[#allocation7 + $0x8] sm:$0xff] %v153_v42  ;;  %v154_v43 = vsel %vm130_vm2, %v269_v30, 0.0  ;;  %v155_v44 = vsel %vm131_vm3, %v271_v34, 0.0  ;;  %vm132_vm4 = vcmp.ge.u32.totalorder %v124_v38, 1073741824  ;;  %v126_v47 = vxor.u32 %v118_v40, %v110_v32 }
  0x2f   :  { %162 = vst [vmem:[#allocation7 + $0x10] sm:$0xff] %v154_v43  ;;  %163 = vst [vmem:[#allocation7 + $0x18] sm:$0xff] %v155_v44  ;;  %v156_v46 = vsel %vm132_vm4, %v273_v39, 0.0  ;;  %vm133_vm5 = vcmp.ge.u32.totalorder %v125_v45, 1073741824  ;;  %v111_v28 = vmul.u32 2221713035, %v103_v49 }
  0x30   :  { %164 = vst [vmem:[#allocation7 + $0x20] sm:$0xff] %v156_v46  ;;  %v157_v23 = vsel %vm133_vm5, %v275_v48, 0.0  ;;  %vm134_vm6 = vcmp.ge.u32.totalorder %v126_v47, 1073741824  ;;  %v151_v34 = vmul.f32 1.3333334, %v143_v50 }
  0x31   :  { %165 = vst [vmem:[#allocation7 + $0x28] sm:$0xff] %v157_v23  ;;  %v158_v51 = vsel %vm134_vm6, %v150_v17, 0.0  ;;  %v119_v30 = vshrl.u32 %v111_v28, 16 }
  0x32   :  { %166 = vst [vmem:[#allocation7 + $0x30] sm:$0xff] %v158_v51 }
  0x33   :  { %v127_v52 = vxor.u32 %v119_v30, %v111_v28 }
  0x35   :  { %vm135_vm7 = vcmp.ge.u32.totalorder %v127_v52, 1073741824 }
  0x36   :  { %v159_v39 = vsel %vm135_vm7, %v151_v34, 0.0 }
  0x37   :  { %167 = vst [vmem:[#allocation7 + $0x38] sm:$0xff] %v159_v39 }
  0x38   :  { %218 = shalt.err (!%p215_p12)
}
  0x39   :  { %s219_s27 = scalar_lea.hbm %s297_s2, 1024 }
  0x3a   :  { %p220_p13 = scmp.ne.s32.totalorder %s297_s2, %s219_s27  ;;  %p223_p0 = scmp.lt.u32.totalorder %s219_s27, %s297_s2 }
  0x3c   :  { %p225_p1 = pnand %p223_p0, %p220_p13 }
  0x3e   :  { %228 = shalt.err (!%p225_p1)
}
  0x3f   :  { %177 = dma.vmem_to_hbm [thread:$0]  %s175_s1, 1024, %s297_s2, [#allocation6]  }
  0x40   :  { %231 = dma.done.wait [#allocation6], 1024  }
  0x41   :  { %232 = vsyncadd [#allocation6], 4294966272 }
  0x42   :  { %181 = vsyncpa [#allocation5], 1 }
  0x43   :  { %182 = vsyncpa [#allocation6], 1 }

</bundles_post_ra>
